<compile_context>
chip_gen: v6e
topology: v6e:2x2x1
jax: 0.10.0
libtpu: 0.0.40
codegen_flags: <defaults>
</compile_context>

<pallas_src>
import numpy as np
import jax
import jax.numpy as jnp
from jax.experimental import pallas as pl
from jax.experimental.pallas import tpu as pltpu

# ----------------------------------------------------------------------------
# Hash-grid encoding (Instant-NGP / torch-ngp GridEncoder semantics), batched
# over levels.  `feature_major=True` returns (L*C, N) so the downstream Pallas
# kernel gets its lane-dense, feature-major layout without an extra transpose.
# ----------------------------------------------------------------------------
_PRIMES = np.array([1, 2654435761, 805459861, 3674653429], dtype=np.uint32)


def grid_encode(x, table, resolutions, hashmap_size, gridtype, feature_major=False):
    """x: (N, D) in [0,1]; table: (L, T, C); resolutions: (L, D) ints."""
    N, D = x.shape
    L, T, C = table.shape
    res = jnp.asarray(np.asarray(resolutions), dtype=jnp.float32)          # (L, D)
    corners = np.stack(np.meshgrid(*([np.arange(2)] * D), indexing="ij"),
                       -1).reshape(-1, D)                                   # (K, D)
    corners_j = jnp.asarray(corners, dtype=jnp.uint32)

    pos = x[None, :, :] * (res[:, None, :] - 1.0)                           # (L, N, D)
    pos0 = jnp.floor(pos)
    frac = pos - pos0                                                       # (L, N, D)
    cc = pos0.astype(jnp.uint32)[:, :, None, :] + corners_j[None, None]     # (L, N, K, D)

    if gridtype == "hash":
        h = cc[..., 0] * jnp.uint32(_PRIMES[0])
        for d in range(1, D):
            h = jnp.bitwise_xor(h, cc[..., d] * jnp.uint32(_PRIMES[d]))
    else:  # 'tiled': row-major flatten of the per-level grid, wrapped into table
        res_i = np.asarray(resolutions, dtype=np.uint64)
        strides = np.concatenate(
            [np.ones((L, 1), np.uint64), np.cumprod(res_i[:, :-1], axis=1)], axis=1)
        strides_j = jnp.asarray((strides % (1 << 32)).astype(np.uint32))    # (L, D)
        h = jnp.sum(cc * strides_j[:, None, None, :], axis=-1, dtype=jnp.uint32)

    idx = (h % jnp.uint32(hashmap_size)).astype(jnp.int32)                  # (L, N, K)
    feats = jax.vmap(lambda tab, ix: tab[ix])(table, idx)                   # (L, N, K, C)
    w = jnp.prod(
        jnp.where(corners_j[None, None] == 1,
                  frac[:, :, None, :], 1.0 - frac[:, :, None, :]), axis=-1) # (L, N, K)
    out = jnp.sum(feats * w[..., None], axis=2)                             # (L, N, C)
    if feature_major:
        return jnp.transpose(out, (0, 2, 1)).reshape(L * C, N)              # (L*C, N)
    return jnp.transpose(out, (1, 0, 2)).reshape(N, L * C)                  # (N, L*C)


# ----------------------------------------------------------------------------
# Fused Pallas kernel: sigmoid mask, space/time encoding blend, shared MLP.
# Feature-major layout: rows are features, columns are sample points (lanes).
# ----------------------------------------------------------------------------
def st_fuse_kernel(enc_ref, mask_ref, w1_ref, w2_ref, out_ref):
    f = w1_ref.shape[1]                                     # w1 is (H, F) transposed
    # Packed bf16 encodings [spatial ; temporal] along sublanes; upcast once.
    # VPU math (sigmoid, blend) stays f32 (v5e has no bf16 VPU).
    enc = enc_ref[...].astype(jnp.float32)                  # (2F, tn)
    m = jax.nn.sigmoid(mask_ref[...])                       # (1, tn), sublane-bcast
    blended = m * enc[:f, :] + (1.0 - m) * enc[f:, :]       # (F, tn) masked ST blend
    # MXU operands in bf16 (native on all generations), f32 accumulation.
    hid = jnp.maximum(
        jnp.dot(w1_ref[...], blended.astype(jnp.bfloat16),
                preferred_element_type=jnp.float32), 0.0)   # (H, tn)
    out_ref[...] = jnp.dot(w2_ref[...], hid.astype(jnp.bfloat16),
                           preferred_element_type=jnp.float32
                           ).astype(out_ref.dtype)          # (O, tn) lane-dense store


# ----------------------------------------------------------------------------
# Tiling / VMEM-budget helpers.
# ----------------------------------------------------------------------------
def _round_up(v, m):
    return (v + m - 1) // m * m


def _chip_config():
    """Returns (VMEM budget we allow this kernel to request, #TensorCores/chip)."""
    kind = ""
    try:
        kind = (jax.devices()[0].device_kind or "").lower()
    except Exception:
        pass
    vmem_phys = (64 << 20) if "v7" in kind else (128 << 20)
    try:  # prefer the real number when the query is available
        vmem_phys = int(pltpu.get_tpu_info().vmem_capacity_bytes)
    except Exception:
        pass
    n_tc = 2 if "v7" in kind else 1
    # leave headroom for Mosaic internal scratch; v7x ends up ~40 MiB,
    # v5e/v6e ~104 MiB.
    budget = max(vmem_phys // 2, vmem_phys - (24 << 20))
    return budget, n_tc


def _per_row_bytes(f2, h, o, out_bytes):
    # double-buffered streams (enc bf16, mask f32 padded to 8 sublanes, out)
    stream = 2 * (f2 * 2 + 8 * 4 + _round_up(o, 8) * out_bytes)
    # f32 in-kernel intermediates (enc upcast + blended + hidden) that may spill
    interm = (f2 + f2 // 2 + h) * 4
    return stream + interm


def _pick_tile(n, tile_n, f2, h, o, out_bytes, n_tc, budget):
    n128 = _round_up(max(n, 1), 128)
    per_row = _per_row_bytes(f2, h, o, out_bytes)
    t = min(tile_n, n128, max(128, (budget - (8 << 20)) // per_row))
    if n_tc > 1:
        # v7x: keep >= 2 "parallel" grid steps (one per TensorCore) and prefer
        # an even step count so neither core idles on the tail step.
        t = min(t, _round_up(-(-n128 // 2), 128))
        steps = -(-n128 // max(t, 1))
        if steps > 2 and steps % 2:
            t = min(t, _round_up(-(-n128 // (steps + 1)), 128))
    return max(128, (t // 128) * 128)


def _vmem_limit(tn, f2, h, o, out_bytes, budget):
    need = _per_row_bytes(f2, h, o, out_bytes) * tn + 2 * 2 * (h * (f2 // 2) + o * h)
    return int(min(budget, max(16 << 20, int(need * 1.5) + (8 << 20))))


# ----------------------------------------------------------------------------
# Wrapper around pallas_call.
# ----------------------------------------------------------------------------
def fused_mask_blend_mlp(enc_st_t, mask_t, w1, w2, *, tile_n=32768,
                         out_dtype=jnp.float32, feature_major_out=False,
                         enc_buffers=None):
    """enc_st_t: (2F, N) bf16, mask_t: (1, N) f32, w1: (F,H), w2: (H,O).

    Returns (N, O) in `out_dtype` (or (O, N) if feature_major_out=True).
    `out_dtype=jnp.bfloat16` roughly halves writeback HBM traffic if the
    consumer tolerates it.  `enc_buffers=3` enables triple buffering on the enc
    stream (sweep only if xprof shows exposed DMA at step boundaries).
    """
    f2, n = enc_st_t.shape
    f, h = w1.shape
    o = w2.shape[1]
    assert f2 == 2 * f
    out_bytes = jnp.dtype(out_dtype).itemsize

    budget, n_tc = _chip_config()
    tn = _pick_tile(n, tile_n, f2, h, o, out_bytes, n_tc, budget)
    n_pad = _round_up(n, tn)
    if n_pad != n:                      # arbitrary N: zero-pad columns, slice back
        enc_st_t = jnp.pad(enc_st_t, ((0, 0), (0, n_pad - n)))
        mask_t = jnp.pad(mask_t, ((0, 0), (0, n_pad - n)))

    # Pre-cast transposed weights to bf16 (MXU-native on every generation).
    w1t = jnp.asarray(w1.T, dtype=jnp.bfloat16)   # (H, F)
    w2t = jnp.asarray(w2.T, dtype=jnp.bfloat16)   # (O, H)

    col = lambda r: pl.BlockSpec((r, tn), lambda i: (0, i))
    whole = lambda shp: pl.BlockSpec(shp, lambda i: (0, 0))
    enc_spec = (col(f2) if enc_buffers is None else
                pl.BlockSpec((f2, tn), lambda i: (0, i),
                             pipeline_mode=pl.Buffered(enc_buffers)))

    out_t = pl.pallas_call(
        st_fuse_kernel,
        out_shape=jax.ShapeDtypeStruct((o, n_pad), out_dtype),
        grid_spec=pltpu.PrefetchScalarGridSpec(
            num_scalar_prefetch=0,
            grid=(n_pad // tn,),
            in_specs=[enc_spec, col(1),
                      # weights are grid-invariant (constant index_map): the
                      # pipeline never re-DMAs them between grid steps.
                      whole((h, f)), whole((o, h))],
            out_specs=col(o),
        ),
        compiler_params=pltpu.CompilerParams(
            dimension_semantics=("parallel",),
            vmem_limit_bytes=_vmem_limit(tn, f2, h, o, out_bytes, budget),
        ),
    )(enc_st_t, mask_t, w1t, w2t)

    out_t = out_t[:, :n]
    return out_t if feature_major_out else out_t.T


# ----------------------------------------------------------------------------
# Module wrapper.
# ----------------------------------------------------------------------------
def encode_inputs(x, params):
    enc_s = grid_encode(x[..., :3], params["spatial_table"],
                        params["spatial_res"], params["spatial_T"], "hash",
                        feature_major=True)                              # (F, N)
    enc_t = grid_encode(x, params["temporal_table"],
                        params["temporal_res"], params["temporal_T"], "hash",
                        feature_major=True)                              # (F, N)
    mask_t = grid_encode(x[..., :3], params["mask_table"],
                         params["mask_res"], params["mask_T"], "tiled",
                         feature_major=True)                             # (1, N)
    # bf16 halves the dominant input HBM stream (encodings are ~1e-4 scale);
    # the mask stays f32 for the sigmoid/blend.
    enc_st_t = jnp.concatenate([enc_s, enc_t], axis=0).astype(jnp.bfloat16)
    return enc_st_t, mask_t.astype(jnp.float32)


def st_module_fuse_forward(x, params, *, tile_n=32768, out_dtype=jnp.float32):
    """Mirrors STModuleFuse.forward: returns (output, spatial_component=None)."""
    enc_st_t, mask_t = encode_inputs(x, params)
    out = fused_mask_blend_mlp(enc_st_t, mask_t, params["w1"], params["w2"],
                               tile_n=tile_n, out_dtype=out_dtype)
    return out, None


# ----------------------------------------------------------------------------
# Deterministic parameter construction (module __init__ semantics, std=1e-4).
# ----------------------------------------------------------------------------
def make_params(key):
    n_output_dim = 16
    num_levels = 4
    features_per_level = 4
    per_level_scale = [1.5, 1.5, 1.5, 1.5]
    base_res = [8, 8, 8, 4]
    log2_hashmap_size = 12            # spatial == temporal (module asserts equality)
    hidden_dim = 32                   # num_layers=2 -> one ReLU hidden layer
    mask_reso = [16, 16, 16]
    mask_log2_hash = 12

    F = num_levels * features_per_level
    Ts = Tt = 2 ** log2_hashmap_size
    Tm = 2 ** mask_log2_hash

    def resolutions(base, scale, levels):
        return np.asarray(
            [[int(np.floor(b * s ** l)) for b, s in zip(base, scale)]
             for l in range(levels)], dtype=np.int64)

    keys = jax.random.split(key, 5)
    return {
        # hash-grid tables, init ~ N(0, 1e-4)  (SpatialTemporalGridEncoder std=0.0001)
        "spatial_table": jax.random.normal(
            keys[0], (num_levels, Ts, features_per_level), jnp.float32) * 1e-4,
        "temporal_table": jax.random.normal(
            keys[1], (num_levels, Tt, features_per_level), jnp.float32) * 1e-4,
        "mask_table": jax.random.normal(keys[2], (1, Tm, 1), jnp.float32) * 1e-4,
        # shared FullyFusedMLP weights (tcnn: no biases): F -> hidden (ReLU) -> out
        "w1": jax.random.normal(keys[3], (F, hidden_dim), jnp.float32) * 0.5,
        "w2": jax.random.normal(keys[4], (hidden_dim, n_output_dim), jnp.float32) * 0.5,
        # static metadata
        "spatial_res": resolutions(base_res[:3], per_level_scale[:3], num_levels),
        "temporal_res": resolutions(base_res, per_level_scale, num_levels),
        "mask_res": np.asarray([mask_reso], dtype=np.int64),
        "spatial_T": Ts, "temporal_T": Tt, "mask_T": Tm,
    }


def ref_forward(enc_st_t, mask_t, params):
    """Plain-JAX f32 reference on the same (bf16) encodings."""
    enc = enc_st_t.astype(jnp.float32)
    f = params["w1"].shape[0]
    m = jax.nn.sigmoid(mask_t.astype(jnp.float32))
    blended = m * enc[:f, :] + (1.0 - m) * enc[f:, :]
    hid = jnp.maximum(jnp.dot(params["w1"].T, blended,
                              precision=jax.lax.Precision.HIGHEST), 0.0)
    return jnp.dot(params["w2"].T, hid, precision=jax.lax.Precision.HIGHEST).T


if __name__ == "__main__":
    key = jax.random.PRNGKey(0)
    k_param, k_x = jax.random.split(key)
    params = make_params(k_param)

    N = 1000                                                  # not a tile multiple
    x = jax.random.uniform(k_x, (N, 4), dtype=jnp.float32)    # (x, y, z, t) in [0,1)

    out, spatial_component = st_module_fuse_forward(x, params)
    jax.block_until_ready(out)

    assert spatial_component is None                          # module returns None
    assert out.shape == (N, 16) and out.dtype == jnp.float32

    # Sanity check against a plain-JAX f32 reference.  Tolerances are loosened
    # relative to pure-f32 because the kernel runs the MLP with bf16 MXU
    # operands (review: precision impact below the bf16 encoding quantization).
    enc_st_t, mask_t = encode_inputs(x, params)
    ref = ref_forward(enc_st_t, mask_t, params)
    assert jnp.allclose(out, ref, atol=1e-4, rtol=5e-2), \
        float(jnp.max(jnp.abs(out - ref)))

    print("KERNEL_OK")
</pallas_src>

<mosaic_0001>
module attributes {stable_mosaic.version = 11 : i64} {
  func.func @st_fuse_kernel(%arg0: i32, %arg1: memref<32x1024xbf16, #tpu.memory_space<vmem>>, %arg2: memref<1x1024xf32, #tpu.memory_space<vmem>>, %arg3: memref<32x16xbf16, #tpu.memory_space<vmem>>, %arg4: memref<16x32xbf16, #tpu.memory_space<vmem>>, %arg5: memref<16x1024xf32, #tpu.memory_space<vmem>>) attributes {dimension_semantics = [#tpu.dimension_semantics<parallel>], iteration_bounds = array<i64: 1>, scalar_prefetch = 0 : i64, scratch_operands = 0 : i64, tpu.core_type = #tpu.core_type<tc>, window_params = [{transform_indices = @transform_0, window_bounds = array<i64: 32, 1024>}, {transform_indices = @transform_1, window_bounds = array<i64: 1, 1024>}, {pipeline_mode = #tpu.pipeline_mode<synchronous>, transform_indices = @transform_2, window_bounds = array<i64: 32, 16>}, {pipeline_mode = #tpu.pipeline_mode<synchronous>, transform_indices = @transform_3, window_bounds = array<i64: 16, 32>}, {transform_indices = @transform_4, window_bounds = array<i64: 16, 1024>}]} {
    %c0 = arith.constant 0 : index
    %c0_0 = arith.constant 0 : index
    %0 = vector.load %arg1[%c0, %c0_0] : memref<32x1024xbf16, #tpu.memory_space<vmem>>, vector<32x1024xbf16>
    %1 = arith.extf %0 : vector<32x1024xbf16> to vector<32x1024xf32>
    %c0_1 = arith.constant 0 : index
    %c0_2 = arith.constant 0 : index
    %2 = vector.load %arg2[%c0_1, %c0_2] : memref<1x1024xf32, #tpu.memory_space<vmem>>, vector<1x1024xf32>
    %3 = arith.negf %2 : vector<1x1024xf32>
    %4 = math.exp %3 : vector<1x1024xf32>
    %cst = arith.constant 1.000000e+00 : f32
    %5 = vector.broadcast %cst : f32 to vector<1x1024xf32>
    %6 = arith.addf %5, %4 : vector<1x1024xf32>
    %7 = arith.divf %5, %6 : vector<1x1024xf32>
    %8 = vector.extract_strided_slice %1 {offsets = [0, 0], sizes = [16, 1024], strides = [1, 1]} : vector<32x1024xf32> to vector<16x1024xf32>
    %9 = vector.broadcast %7 : vector<1x1024xf32> to vector<16x1024xf32>
    %10 = arith.mulf %9, %8 : vector<16x1024xf32>
    %cst_3 = arith.constant 1.000000e+00 : f32
    %11 = vector.broadcast %cst_3 : f32 to vector<1x1024xf32>
    %12 = arith.subf %11, %7 : vector<1x1024xf32>
    %13 = vector.extract_strided_slice %1 {offsets = [16, 0], sizes = [16, 1024], strides = [1, 1]} : vector<32x1024xf32> to vector<16x1024xf32>
    %14 = vector.broadcast %12 : vector<1x1024xf32> to vector<16x1024xf32>
    %15 = arith.mulf %14, %13 : vector<16x1024xf32>
    %16 = arith.addf %10, %15 : vector<16x1024xf32>
    %c0_4 = arith.constant 0 : index
    %c0_5 = arith.constant 0 : index
    %17 = vector.load %arg3[%c0_4, %c0_5] : memref<32x16xbf16, #tpu.memory_space<vmem>>, vector<32x16xbf16>
    %18 = arith.truncf %16 : vector<16x1024xf32> to vector<16x1024xbf16>
    %cst_6 = arith.constant dense<0.000000e+00> : vector<32x1024xf32>
    %19 = tpu.matmul %17, %18, %cst_6 {dimension_numbers = #tpu.dot_dimension_numbers<[1], [0], [0], [1], [0, 0, 1, 1], [], []>} : vector<32x16xbf16>, vector<16x1024xbf16>, vector<32x1024xf32> -> vector<32x1024xf32>
    %cst_7 = arith.constant 0.000000e+00 : f32
    %20 = vector.broadcast %cst_7 : f32 to vector<32x1024xf32>
    %21 = arith.maximumf %19, %20 : vector<32x1024xf32>
    %c0_8 = arith.constant 0 : index
    %c0_9 = arith.constant 0 : index
    %22 = vector.load %arg4[%c0_8, %c0_9] : memref<16x32xbf16, #tpu.memory_space<vmem>>, vector<16x32xbf16>
    %23 = arith.truncf %21 : vector<32x1024xf32> to vector<32x1024xbf16>
    %cst_10 = arith.constant dense<0.000000e+00> : vector<16x1024xf32>
    %24 = tpu.matmul %22, %23, %cst_10 {dimension_numbers = #tpu.dot_dimension_numbers<[1], [0], [0], [1], [0, 0, 1, 1], [], []>} : vector<16x32xbf16>, vector<32x1024xbf16>, vector<16x1024xf32> -> vector<16x1024xf32>
    %c0_11 = arith.constant 0 : index
    %c0_12 = arith.constant 0 : index
    %25 = vector.load %arg5[%c0_11, %c0_12] : memref<16x1024xf32, #tpu.memory_space<vmem>>, vector<16x1024xf32>
    tpu.vector_store %arg5[%c0_11, %c0_12], %24 {strides = array<i32>} : memref<16x1024xf32, #tpu.memory_space<vmem>>, vector<16x1024xf32>,
    return
  }
  func.func @transform_0(%arg0: i32) -> (i32, i32) {
    %c0_i32 = arith.constant 0 : i32
    %c0_i32_0 = arith.constant 0 : i32
    return %c0_i32, %arg0 : i32, i32
  }
  func.func @transform_1(%arg0: i32) -> (i32, i32) {
    %c0_i32 = arith.constant 0 : i32
    %c0_i32_0 = arith.constant 0 : i32
    return %c0_i32, %arg0 : i32, i32
  }
  func.func @transform_2(%arg0: i32) -> (i32, i32) {
    %c0_i32 = arith.constant 0 : i32
    %c0_i32_0 = arith.constant 0 : i32
    %c0_i32_1 = arith.constant 0 : i32
    return %c0_i32, %c0_i32_0 : i32, i32
  }
  func.func @transform_3(%arg0: i32) -> (i32, i32) {
    %c0_i32 = arith.constant 0 : i32
    %c0_i32_0 = arith.constant 0 : i32
    %c0_i32_1 = arith.constant 0 : i32
    return %c0_i32, %c0_i32_0 : i32, i32
  }
  func.func @transform_4(%arg0: i32) -> (i32, i32) {
    %c0_i32 = arith.constant 0 : i32
    %c0_i32_0 = arith.constant 0 : i32
    return %c0_i32, %arg0 : i32, i32
  }
}

</mosaic_0001>

<bundles_post_ra>
// kernel: tpu_custom_call.1
= control target key start
LH: loop header
LB: loop body
LE: loop exit
PB: predicated region body
PF: predicated region fallthrough
CT: control target
= control target key end

     0   :  { %9 = vsyncpa [#allocation3], 0  ;;  %s998_s0 = inlined_call_operand.hbm [shape: bf16[32,1024], index: 0, kind: input, shape index: {}]   ;;  %s999_s1 = inlined_call_operand.vmem [shape: f32[1,1024], index: 1, kind: input, shape index: {}]   ;;  %s1000_s2 = inlined_call_operand.vmem [shape: bf16[32,16], index: 2, kind: input, shape index: {}]   ;;  %s1001_s3 = inlined_call_operand.vmem [shape: bf16[16,32], index: 3, kind: input, shape index: {}]   ;;  %s1002_s4 = inlined_call_operand.hbm [shape: f32[16,1024], index: 4, kind: output, shape index: {}]  }
   0x1   :  { %10 = vsyncpa [#allocation4], 0  ;;  %s798_s15 = smov [#allocation2]  }
   0x2   :  { %s16_s16 = sshll.u32 %s798_s15, 4  ;;  %s17_s16 = int_to_ptr.vmem [resolvable:$true] %s16_s16 }
   0x3   :  { %s762_s17 = scalar_lea.vmem %s17_s16, 2048  ;;  %p767_p1 = scmp.lt.s32.totalorder %s17_s16, %s17_s16 }
   0x4   :  { %p763_p0 = scmp.ne.s32.totalorder %s17_s16, %s762_s17  ;;  %p768_p2 = scmp.lt.s32.totalorder %s762_s17, %s762_s17 }
   0x6   :  { %p769_p3 = por %p768_p2, %p767_p1 }
   0x8   :  { %p770_p4 = pnand %p769_p3, %p763_p0 }
   0xa   :  { %773 = shalt.err (!%p770_p4)
}
   0xb   :  { %s799_s18 = smov 512   ;;  %s800_s19 = smov 32  }
   0xc   :  { %22 = dma.hbm_to_vmem [thread:$0]  %s998_s0, 2048, %s17_s16, [#allocation3], %s799_s18, %s799_s18, %s800_s19  }
   0xd   :  { %794 = dma.done.wait [#allocation3], 2048  }
   0xe   :  { %795 = vsyncadd [#allocation3], 4294965248  ;;  %v1003_v0 = vmov 0   ;;  %v81_v1 = vld [vmem:[%s999_s1] sm:$0xff]  ;;  %v89_v3 = vlaneseq  ;;  %v849_v12 = vld [vmem:[#allocation2 + $0x8] sm:$0xff]  ;;  %vm241_vm0 = vcmask 130048  }
   0xf   :  { %280 = vmatprep.mubr.bf16.mxu0 %v1003_v0  ;;  %333 = vmatprep.mubr.bf16.mxu1 %v1003_v0  ;;  %v724_v2 = vmul.f32 -1.442695, %v81_v1  ;;  %v840_v7 = vld [vmem:[#allocation2] sm:$0xff]  ;;  %v854_v16 = vld [vmem:[#allocation2 + $0x28] sm:$0xff]  ;;  %v52_v27 = vunpack.c.h.bf16 %v849_v12  ;;  %v871_v30 = vld [vmem:[#allocation2 + $0x10] sm:$0xff]  ;;  %v51_v39 = vunpack.c.l.bf16 %v849_v12  ;;  %vm515_vm1 = vcmask 261120  }
  0x10   :  { %v838_v6 = vshrl.u32 %v89_v3, 7  ;;  %v842_v8 = vld [vmem:[#allocation2 + $0x20] sm:$0xff]  ;;  %v856_v17 = vld [vmem:[#allocation2 + $0x48] sm:$0xff]  ;;  %v50_v22 = vunpack.c.h.bf16 %v840_v7  ;;  %v49_v28 = vunpack.c.l.bf16 %v840_v7  ;;  %v873_v31 = vld [vmem:[#allocation2 + $0x30] sm:$0xff]  ;;  %v60_v32 = vunpack.c.h.bf16 %v854_v16 }
  0x11   :  { %750 = vpow2.f32 %v724_v2  ;;  %v844_v9 = vld [vmem:[#allocation2 + $0x40] sm:$0xff]  ;;  %v858_v18 = vld [vmem:[#allocation2 + $0x68] sm:$0xff]  ;;  %v58_v23 = vunpack.c.h.bf16 %v842_v8  ;;  %v57_v29 = vunpack.c.l.bf16 %v842_v8  ;;  %v68_v33 = vunpack.c.h.bf16 %v856_v17  ;;  %v879_v36 = vld [vmem:[#allocation2 + $0x50] sm:$0xff] }
  0x12   :  { %v846_v10 = vld [vmem:[#allocation2 + $0x60] sm:$0xff]  ;;  %v95_v11 = vsub.s32 1, %v838_v6  ;;  %v103_v13 = vsub.s32 3, %v838_v6  ;;  %v91_v14 = vsub.s32 0, %v838_v6  ;;  %v99_v15 = vsub.s32 2, %v838_v6  ;;  %v881_v37 = vld [vmem:[#allocation2 + $0x70] sm:$0xff] }
  0x13   :  { %v111_v19 = vsub.s32 5, %v838_v6  ;;  %v119_v20 = vsub.s32 7, %v838_v6  ;;  %v1005_v21 = vsub.s32 4, %v838_v6  ;;  %v66_v24 = vunpack.c.h.bf16 %v844_v9  ;;  %v887_v42 = vld [vmem:[#allocation2 + $0x18] sm:$0xff] }
  0x14   :  { %v74_v26 = vunpack.c.h.bf16 %v846_v10  ;;  %v76_v34 = vunpack.c.h.bf16 %v858_v18  ;;  %v65_v35 = vunpack.c.l.bf16 %v844_v9  ;;  %v73_v38 = vunpack.c.l.bf16 %v846_v10  ;;  %v889_v43 = vld [vmem:[#allocation2 + $0x38] sm:$0xff] }
  0x15   :  { %v59_v40 = vunpack.c.l.bf16 %v854_v16  ;;  %v67_v41 = vunpack.c.l.bf16 %v856_v17  ;;  %v75_v44 = vunpack.c.l.bf16 %v858_v18  ;;  %v53_v45 = vunpack.c.l.bf16 %v871_v30  ;;  %v895_v48 = vld [vmem:[#allocation2 + $0x58] sm:$0xff] }
  0x16   :  { %v54_v46 = vunpack.c.h.bf16 %v871_v30  ;;  %v61_v47 = vunpack.c.l.bf16 %v873_v31  ;;  %v897_v49 = vld [vmem:[#allocation2 + $0x78] sm:$0xff]  ;;  %v62_v50 = vunpack.c.h.bf16 %v873_v31  ;;  %v70_v52 = vunpack.c.h.bf16 %v879_v36 }
  0x17   :  { %v56_v56 = vunpack.c.h.bf16 %v887_v42  ;;  %v64_v59 = vunpack.c.h.bf16 %v889_v43  ;;  %v72_v61 = vunpack.c.h.bf16 %v895_v48  ;;  %v80_v62 = vunpack.c.h.bf16 %v897_v49 }
  0x1e   :  { %v751_v4 = vpop.eup %750 }
  0x1f   :  { %v85_v5 = vadd.f32 1.0, %v751_v4 }
  0x21   :  { %752 = vrcp.f32 %v85_v5 }
  0x2e   :  { %v753_v58 = vpop.eup %752 }
  0x2f   :  { %v96_v63 = vrot.slane %v753_v58, %v95_v11  ;;  %v145_v1 = vsub.f32 1.0, %v753_v58  ;;  %v104_v2 = vrot.slane %v753_v58, %v103_v13  ;;  %v92_v3 = vrot.slane %v753_v58, %v91_v14 }
  0x30   :  { %v100_v4 = vrot.slane %v753_v58, %v99_v15  ;;  %v112_v5 = vrot.slane %v753_v58, %v111_v19  ;;  %v120_v7 = vrot.slane %v753_v58, %v119_v20  ;;  %v108_v8 = vrot.slane %v753_v58, %v1005_v21 }
  0x31   :  { %v130_v9 = vmul.f32 %v96_v63, %v50_v22  ;;  %v138_v10 = vmul.f32 %v96_v63, %v58_v23  ;;  %v154_v12 = vrot.slane %v145_v1, %v95_v11  ;;  %v132_v16 = vmul.f32 %v104_v2, %v52_v27 }
  0x32   :  { %v140_v17 = vmul.f32 %v104_v2, %v60_v32  ;;  %v162_v18 = vrot.slane %v145_v1, %v103_v13  ;;  %v129_v0 = vmul.f32 %v92_v3, %v49_v28  ;;  %v137_v60 = vmul.f32 %v92_v3, %v57_v29 }
  0x33   :  { %v188_v57 = vmul.f32 %v154_v12, %v66_v24  ;;  %v196_v55 = vmul.f32 %v154_v12, %v74_v26  ;;  %v150_v53 = vrot.slane %v145_v1, %v91_v14  ;;  %v131_v51 = vmul.f32 %v100_v4, %v51_v39 }
  0x34   :  { %v190_v25 = vmul.f32 %v162_v18, %v68_v33  ;;  %v198_v54 = vmul.f32 %v162_v18, %v76_v34  ;;  %v139_v21 = vmul.f32 %v100_v4, %v59_v40  ;;  %v158_v11 = vrot.slane %v145_v1, %v99_v15 }
  0x35   :  { %v204_v22 = vadd.f32 %v188_v57, %v130_v9  ;;  %v212_v23 = vadd.f32 %v196_v55, %v138_v10  ;;  %v187_v27 = vmul.f32 %v150_v53, %v65_v35  ;;  %v195_v32 = vmul.f32 %v150_v53, %v73_v38  ;;  %v747_v38 = vld [vmem:[%s1000_s2] sm:$0xff]  }
  0x36   :  { %v206_v13 = vadd.f32 %v190_v25, %v132_v16  ;;  %v214_v28 = vadd.f32 %v198_v54, %v140_v17  ;;  %v189_v29 = vmul.f32 %v158_v11, %v67_v41  ;;  %v197_v24 = vmul.f32 %v158_v11, %v75_v44  ;;  %v748_v17 = vld [vmem:[%s1000_s2 + $0x8] sm:$0xff]  }
  0x37   :  { %v224_v26 = vpack.c.bf16 %v212_v23, %v204_v22  ;;  %v203_v63 = vadd.f32 %v187_v27, %v129_v0  ;;  %v211_v2 = vadd.f32 %v195_v32, %v137_v60  ;;  %v134_v14 = vmul.f32 %v112_v5, %v54_v46 }
  0x38   :  { %v226_v39 = vpack.c.bf16 %v214_v28, %v206_v13  ;;  %v205_v3 = vadd.f32 %v189_v29, %v131_v51  ;;  %v213_v33 = vadd.f32 %v197_v24, %v139_v21  ;;  %v142_v34 = vmul.f32 %v112_v5, %v62_v50 }
  0x39   :  { %262 = vmatprep.subr.bf16.mxu0 %v224_v26  ;;  %v223_v40 = vpack.c.bf16 %v211_v2, %v203_v63  ;;  %v170_v15 = vrot.slane %v145_v1, %v111_v19  ;;  %v136_v55 = vmul.f32 %v120_v7, %v56_v56  ;;  %v144_v35 = vmul.f32 %v120_v7, %v64_v59 }
  0x3a   :  { %315 = vmatprep.subr.bf16.mxu1 %v226_v39  ;;  %v225_v25 = vpack.c.bf16 %v213_v33, %v205_v3  ;;  %v178_v0 = vrot.slane %v145_v1, %v119_v20  ;;  %v133_v21 = vmul.f32 %v108_v8, %v53_v45  ;;  %v141_v41 = vmul.f32 %v108_v8, %v61_v47 }
  0x3b   :  { %263 = vmatpush1.bf16.msra.mxu0 %v223_v40  ;;  %v192_v19 = vmul.f32 %v170_v15, %v70_v52  ;;  %v1006_v44 = vunpack.c.h.bf16 %v881_v37  ;;  %v1007_v50 = vsub.s32 4, %v838_v6  ;;  %v1008_v53 = vsub.s32 6, %v838_v6 }
  0x3c   :  { %316 = vmatpush1.bf16.msra.mxu1 %v225_v25  ;;  %v79_v20 = vunpack.c.l.bf16 %v897_v49  ;;  %v194_v30 = vmul.f32 %v178_v0, %v72_v61  ;;  %v202_v45 = vmul.f32 %v178_v0, %v80_v62  ;;  %v1010_v52 = vunpack.c.l.bf16 %v879_v36 }
  0x3d   :  { %v200_v46 = vmul.f32 %v170_v15, %v1006_v44  ;;  %v166_v51 = vrot.slane %v145_v1, %v1007_v50  ;;  %v116_v54 = vrot.slane %v753_v58, %v1008_v53  ;;  %v1009_v31 = vmov %v1008_v53 }
  0x3e   :  { %v174_v47 = vrot.slane %v145_v1, %v1009_v31  ;;  %v208_v56 = vadd.f32 %v192_v19, %v134_v14  ;;  %v1011_v60 = vunpack.c.l.bf16 %v881_v37  ;;  %727 = vmatmul.mubr.msk.bf16.vlgmr.msra.gmra.mxu0 %vm241_vm0, %v747_v38  ;;  %v210_v5 = vadd.f32 %v194_v30, %v136_v55 }
  0x3f   :  { %v216_v57 = vadd.f32 %v200_v46, %v142_v34  ;;  %v191_v59 = vmul.f32 %v166_v51, %v1010_v52  ;;  %v218_v58 = vadd.f32 %v202_v45, %v144_v35  ;;  %v1012_v7 = vunpack.c.l.bf16 %v887_v42  ;;  %729 = vmatmul.mubr.msk.bf16.vlgmr.msra.gmra.mxu1 %vm241_vm0, %v747_v38 }
  0x40   :  { %v199_v4 = vmul.f32 %v166_v51, %v1011_v60  ;;  %v1013_v61 = vunpack.c.l.bf16 %v889_v43  ;;  %v1014_v36 = vunpack.c.l.bf16 %v895_v48  ;;  %v201_v10 = vmul.f32 %v174_v47, %v79_v20 }
  0x41   :  { %v135_v49 = vmul.f32 %v116_v54, %v1012_v7  ;;  %v228_v6 = vpack.c.bf16 %v216_v57, %v208_v56  ;;  %v207_v1 = vadd.f32 %v191_v59, %v133_v21  ;;  %v230_v37 = vpack.c.bf16 %v218_v58, %v210_v5 }
  0x42   :  { %v143_v62 = vmul.f32 %v116_v54, %v1013_v61  ;;  %v215_v8 = vadd.f32 %v199_v4, %v141_v41  ;;  %v193_v9 = vmul.f32 %v174_v47, %v1014_v36  ;;  %v1015_v12 = vmov 0  }
  0x43   :  { %290 = vmatprep.mubr.bf16.mxu0 %v1015_v12  ;;  %343 = vmatprep.mubr.bf16.mxu1 %v1015_v12 }
  0x44   :  { %368 = vmatprep.subr.bf16.mxu0 %v228_v6  ;;  %v227_v42 = vpack.c.bf16 %v215_v8, %v207_v1  ;;  %v209_v16 = vadd.f32 %v193_v9, %v135_v49  ;;  %421 = vmatprep.subr.bf16.mxu1 %v230_v37  ;;  %v217_v43 = vadd.f32 %v201_v10, %v143_v62  ;;  %v749_v49 = vld [vmem:[%s1001_s3] sm:$0xff]   ;;  %s802_s3 = smov [#allocation5]  }
  0x45   :  { %s712_s27 = sshll.u32 %s802_s3, 4  ;;  %s713_s27 = int_to_ptr.vmem [resolvable:$true] %s712_s27 }
  0x46   :  { %369 = vmatpush1.bf16.msra.mxu0 %v227_v42  ;;  %v229_v18 = vpack.c.bf16 %v217_v43, %v209_v16  ;;  %s774_s28 = scalar_lea.vmem %s713_s27, 2048  ;;  %p779_p6 = scmp.lt.s32.totalorder %s713_s27, %s713_s27 }
  0x47   :  { %728 = vmatmul.mubr.msk.bf16.gmra.mxu0 %vm241_vm0, %v748_v17  ;;  %730 = vmatmul.mubr.msk.bf16.gmra.mxu1 %vm241_vm0, %v748_v17  ;;  %p775_p5 = scmp.ne.s32.totalorder %s713_s27, %s774_s28  ;;  %p780_p7 = scmp.lt.s32.totalorder %s774_s28, %s774_s28 }
  0x48   :  { %422 = vmatpush1.bf16.msra.mxu1 %v229_v18  ;;  %386 = vmatprep.mubr.bf16.mxu0 %v1015_v12 }
  0x49   :  { %439 = vmatprep.mubr.bf16.mxu1 %v1015_v12  ;;  %p781_p8 = por %p780_p7, %p779_p6 }
  0x4b   :  { %p782_p9 = pnand %p781_p8, %p775_p5 }
  0x4f   :  { %731 = vmatmul.mubr.msk.bf16.vlgmr.msra.gmra.mxu0 %vm241_vm0, %v747_v38  ;;  %733 = vmatmul.mubr.msk.bf16.vlgmr.msra.gmra.mxu1 %vm241_vm0, %v747_v38 }
  0x50   :  { %396 = vmatprep.mubr.bf16.mxu0 %v1015_v12  ;;  %449 = vmatprep.mubr.bf16.mxu1 %v1015_v12 }
  0x57   :  { %732 = vmatmul.mubr.msk.bf16.gmra.mxu0 %vm241_vm0, %v748_v17  ;;  %734 = vmatmul.mubr.msk.bf16.gmra.mxu1 %vm241_vm0, %v748_v17 }
  0x58   :  { %551 = vmatprep.mubr.bf16.mxu0 %v1015_v12  ;;  %594 = vmatprep.mubr.bf16.mxu1 %v1015_v12 }
  0xfe   :  { %v282_v48 = vpop.f32.mrf.mxu0 }
  0xff   :  { %v335_v11 = vpop.f32.mrf.mxu1  ;;  %v460_v56 = vmax.f32 %v282_v48, 0.0 }
 0x100   :  { %v284_v22 = vpop.f32.mrf.mxu0  ;;  %v462_v59 = vmax.f32 %v335_v11, 0.0 }
 0x101   :  { %v337_v23 = vpop.f32.mrf.mxu1  ;;  %v461_v41 = vmax.f32 %v284_v22, 0.0 }
 0x102   :  { %v286_v27 = vpop.f32.mrf.mxu0  ;;  %v463_v50 = vmax.f32 %v337_v23, 0.0 }
 0x103   :  { %v339_v32 = vpop.f32.mrf.mxu1  ;;  %v468_v51 = vmax.f32 %v286_v27, 0.0 }
 0x104   :  { %v288_v13 = vpop.f32.mrf.mxu0  ;;  %v470_v30 = vmax.f32 %v339_v32, 0.0 }
 0x105   :  { %v341_v28 = vpop.f32.mrf.mxu1  ;;  %v469_v33 = vmax.f32 %v288_v13, 0.0  ;;  %v494_v4 = vpack.c.bf16 %v468_v51, %v460_v56 }
 0x106   :  { %v471_v35 = vmax.f32 %v341_v28, 0.0  ;;  %v496_v58 = vpack.c.bf16 %v470_v30, %v462_v59 }
 0x107   :  { %v292_v29 = vpop.f32.mrf.mxu0  ;;  %v345_v24 = vpop.f32.mrf.mxu1  ;;  %v495_v45 = vpack.c.bf16 %v469_v33, %v461_v41 }
 0x108   :  { %v476_v25 = vmax.f32 %v292_v29, 0.0  ;;  %v478_v19 = vmax.f32 %v345_v24, 0.0  ;;  %v497_v57 = vpack.c.bf16 %v471_v35, %v463_v50 }
 0x109   :  { %v294_v26 = vpop.f32.mrf.mxu0  ;;  %v347_v63 = vpop.f32.mrf.mxu1 }
 0x10a   :  { %v477_v34 = vmax.f32 %v294_v26, 0.0  ;;  %v479_v38 = vmax.f32 %v347_v63, 0.0 }
 0x10b   :  { %v296_v2 = vpop.f32.mrf.mxu0  ;;  %v349_v14 = vpop.f32.mrf.mxu1 }
 0x10c   :  { %v484_v39 = vmax.f32 %v296_v2, 0.0  ;;  %v486_v40 = vmax.f32 %v349_v14, 0.0 }
 0x10d   :  { %v298_v3 = vpop.f32.mrf.mxu0  ;;  %v351_v55 = vpop.f32.mrf.mxu1 }
 0x10e   :  { %v485_v15 = vmax.f32 %v298_v3, 0.0  ;;  %v487_v0 = vmax.f32 %v351_v55, 0.0  ;;  %v502_v53 = vpack.c.bf16 %v484_v39, %v476_v25  ;;  %v504_v31 = vpack.c.bf16 %v486_v40, %v478_v19 }
 0x10f   :  { %v980_v21 = vpop.f32.mrf.mxu0  ;;  %v982_v46 = vpop.f32.mrf.mxu1 }
 0x110   :  { %v503_v44 = vpack.c.bf16 %v485_v15, %v477_v34  ;;  %v505_v54 = vpack.c.bf16 %v487_v0, %v479_v38  ;;  %v464_v2 = vmax.f32 %v980_v21, 0.0  ;;  %v466_v39 = vmax.f32 %v982_v46, 0.0 }
 0x111   :  { %v390_v20 = vpop.f32.mrf.mxu0  ;;  %v443_v47 = vpop.f32.mrf.mxu1 }
 0x112   :  { %531 = vmatprep.subr.bf16.mxu0 %v503_v44  ;;  %574 = vmatprep.subr.bf16.mxu1 %v505_v54  ;;  %v465_v23 = vmax.f32 %v390_v20, 0.0  ;;  %v467_v13 = vmax.f32 %v443_v47, 0.0 }
 0x113   :  { %v392_v52 = vpop.f32.mrf.mxu0  ;;  %532 = vmatpush1.bf16.msra.mxu0 %v502_v53  ;;  %v445_v60 = vpop.f32.mrf.mxu1  ;;  %575 = vmatpush1.bf16.msra.mxu1 %v504_v31 }
 0x114   :  { %533 = vmatprep.subr.bf16.mxu0 %v495_v45  ;;  %576 = vmatprep.subr.bf16.mxu1 %v497_v57  ;;  %v472_v28 = vmax.f32 %v392_v52, 0.0  ;;  %v474_v26 = vmax.f32 %v445_v60, 0.0 }
 0x115   :  { %v394_v5 = vpop.f32.mrf.mxu0  ;;  %v447_v7 = vpop.f32.mrf.mxu1 }
 0x116   :  { %v473_v10 = vmax.f32 %v394_v5, 0.0  ;;  %v475_v18 = vmax.f32 %v447_v7, 0.0  ;;  %v498_v3 = vpack.c.bf16 %v472_v28, %v464_v2  ;;  %v500_v33 = vpack.c.bf16 %v474_v26, %v466_v39 }
 0x117   :  { %v398_v61 = vpop.f32.mrf.mxu0  ;;  %534 = vmatpush1.bf16.msra.mxu0 %v494_v4  ;;  %v451_v62 = vpop.f32.mrf.mxu1  ;;  %577 = vmatpush1.bf16.msra.mxu1 %v496_v58 }
 0x118   :  { %v480_v48 = vmax.f32 %v398_v61, 0.0  ;;  %v482_v27 = vmax.f32 %v451_v62, 0.0  ;;  %v501_v14 = vpack.c.bf16 %v475_v18, %v467_v13 }
 0x119   :  { %v400_v6 = vpop.f32.mrf.mxu0  ;;  %v453_v1 = vpop.f32.mrf.mxu1 }
 0x11a   :  { %736 = vmatmul.mubr.msk.bf16.vlgmr.msra.gmra.mxu0 %vm515_vm1, %v749_v49  ;;  %737 = vmatmul.mubr.msk.bf16.vlgmr.msra.gmra.mxu1 %vm515_vm1, %v749_v49  ;;  %v481_v42 = vmax.f32 %v400_v6, 0.0  ;;  %v483_v11 = vmax.f32 %v453_v1, 0.0 }
 0x11b   :  { %v402_v8 = vpop.f32.mrf.mxu0  ;;  %637 = vmatprep.mubr.bf16.mxu0 %v1015_v12  ;;  %v455_v36 = vpop.f32.mrf.mxu1  ;;  %680 = vmatprep.mubr.bf16.mxu1 %v1015_v12  ;;  %v499_v12 = vpack.c.bf16 %v473_v10, %v465_v23 }
 0x11c   :  { %v488_v9 = vmax.f32 %v402_v8, 0.0  ;;  %v490_v16 = vmax.f32 %v455_v36, 0.0 }
 0x11d   :  { %v404_v37 = vpop.f32.mrf.mxu0  ;;  %v457_v17 = vpop.f32.mrf.mxu1 }
 0x11e   :  { %v489_v43 = vmax.f32 %v404_v37, 0.0  ;;  %v491_v22 = vmax.f32 %v457_v17, 0.0  ;;  %v506_v29 = vpack.c.bf16 %v488_v9, %v480_v48  ;;  %v508_v63 = vpack.c.bf16 %v490_v16, %v482_v27 }
 0x120   :  { %v507_v32 = vpack.c.bf16 %v489_v43, %v481_v42  ;;  %v509_v24 = vpack.c.bf16 %v491_v22, %v483_v11 }
 0x122   :  { %617 = vmatprep.subr.bf16.mxu0 %v507_v32  ;;  %660 = vmatprep.subr.bf16.mxu1 %v509_v24 }
 0x123   :  { %618 = vmatpush1.bf16.msra.mxu0 %v506_v29  ;;  %661 = vmatpush1.bf16.msra.mxu1 %v508_v63 }
 0x124   :  { %619 = vmatprep.subr.bf16.mxu0 %v499_v12  ;;  %662 = vmatprep.subr.bf16.mxu1 %v501_v14 }
 0x127   :  { %620 = vmatpush1.bf16.msra.mxu0 %v498_v3  ;;  %663 = vmatpush1.bf16.msra.mxu1 %v500_v33 }
 0x12a   :  { %738 = vmatmul.mubr.msk.bf16.vlgmr.msra.gmra.mxu0 %vm515_vm1, %v749_v49  ;;  %739 = vmatmul.mubr.msk.bf16.vlgmr.msra.gmra.mxu1 %vm515_vm1, %v749_v49 }
 0x1da   :  { %v553_v34 = vpop.f32.mrf.mxu0  ;;  %v596_v40 = vpop.f32.mrf.mxu1 }
 0x1db   :  { %691 = vst [vmem:[#allocation5] sm:$0xff] %v553_v34  ;;  %693 = vst [vmem:[#allocation5 + $0x10] sm:$0xff] %v596_v40 }
 0x1dc   :  { %v555_v15 = vpop.f32.mrf.mxu0  ;;  %v598_v55 = vpop.f32.mrf.mxu1 }
 0x1dd   :  { %692 = vst [vmem:[#allocation5 + $0x8] sm:$0xff] %v555_v15  ;;  %694 = vst [vmem:[#allocation5 + $0x18] sm:$0xff] %v598_v55 }
 0x1de   :  { %v557_v35 = vpop.f32.mrf.mxu0  ;;  %v600_v25 = vpop.f32.mrf.mxu1 }
 0x1df   :  { %699 = vst [vmem:[#allocation5 + $0x40] sm:$0xff] %v557_v35  ;;  %701 = vst [vmem:[#allocation5 + $0x50] sm:$0xff] %v600_v25 }
 0x1e0   :  { %v559_v38 = vpop.f32.mrf.mxu0  ;;  %v602_v0 = vpop.f32.mrf.mxu1 }
 0x1e1   :  { %700 = vst [vmem:[#allocation5 + $0x48] sm:$0xff] %v559_v38  ;;  %702 = vst [vmem:[#allocation5 + $0x58] sm:$0xff] %v602_v0 }
 0x1ea   :  { %v639_v21 = vpop.f32.mrf.mxu0  ;;  %v682_v41 = vpop.f32.mrf.mxu1 }
 0x1eb   :  { %695 = vst [vmem:[#allocation5 + $0x20] sm:$0xff] %v639_v21  ;;  %697 = vst [vmem:[#allocation5 + $0x30] sm:$0xff] %v682_v41 }
 0x1ec   :  { %v641_v19 = vpop.f32.mrf.mxu0  ;;  %v684_v44 = vpop.f32.mrf.mxu1 }
 0x1ed   :  { %696 = vst [vmem:[#allocation5 + $0x28] sm:$0xff] %v641_v19  ;;  %698 = vst [vmem:[#allocation5 + $0x38] sm:$0xff] %v684_v44 }
 0x1ee   :  { %v643_v46 = vpop.f32.mrf.mxu0  ;;  %v686_v50 = vpop.f32.mrf.mxu1 }
 0x1ef   :  { %703 = vst [vmem:[#allocation5 + $0x60] sm:$0xff] %v643_v46  ;;  %705 = vst [vmem:[#allocation5 + $0x70] sm:$0xff] %v686_v50 }
 0x1f0   :  { %v645_v51 = vpop.f32.mrf.mxu0  ;;  %v688_v53 = vpop.f32.mrf.mxu1 }
 0x1f1   :  { %704 = vst [vmem:[#allocation5 + $0x68] sm:$0xff] %v645_v51  ;;  %706 = vst [vmem:[#allocation5 + $0x78] sm:$0xff] %v688_v53 }
 0x1f2   :  { %785 = shalt.err (!%p782_p9)
}
 0x1f3   :  { %s803_s29 = smov 1024   ;;  %s804_s30 = smov 64  }
 0x1f4   :  { %718 = dma.vmem_to_hbm [thread:$0]  %s713_s27, 2048, %s1002_s4, [#allocation4], %s803_s29, %s803_s29, %s804_s30  }
 0x1f5   :  { %796 = dma.done.wait [#allocation4], 2048  }
 0x1f6   :  { %797 = vsyncadd [#allocation4], 4294965248 }
 0x1f7   :  { %722 = vsyncpa [#allocation3], 1 }
 0x1f8   :  { %723 = vsyncpa [#allocation4], 1 }

</bundles_post_ra>
